<compile_context>
chip_gen: v5e
topology: v5e:2x2
jax: 0.10.0
libtpu: 0.0.40
codegen_flags: <defaults>
</compile_context>

<pallas_src>
import functools
import math

import jax
import jax.numpy as jnp
from jax.experimental import pallas as pl
from jax.experimental.pallas import tpu as pltpu


def _round_up(x, m):
    return ((x + m - 1) // m) * m


def _pick_tile(n_p128, target):
    """Tile (multiple of 128) <= target for an axis already rounded to 128.
    Prefers exact divisors of n_p128 (zero padding waste); falls back to a
    padded ragged tail only when every divisor is much smaller than the target
    and the extra padding stays modest."""
    target = max(128, min(target, n_p128))
    target -= target % 128
    best = 128
    for t in range(target, 127, -128):
        if n_p128 % t == 0:
            best = t
            break
    if 2 * best >= target:
        return best, n_p128
    padded = _round_up(n_p128, target)
    if padded - n_p128 <= n_p128 // 8:      # <= ~12.5% wasted rows/cols
        return target, padded
    return best, n_p128


def _pick_divisor_tile(n_p, target):
    """Largest multiple-of-128 tile <= target that divides n_p exactly."""
    target = max(128, min(target, n_p))
    target -= target % 128
    for t in range(target, 127, -128):
        if n_p % t == 0:
            return t
    return 128


def _tpu_defaults():
    """Generation-aware tile targets and scoped-VMEM limit."""
    kind = ""
    try:
        kind = jax.devices()[0].device_kind.lower()
    except Exception:
        pass
    if "7" in kind:        # v7x: 64 MiB VMEM/TC, 2 TCs/chip, ~3.2 TB/s HBM
        cfg = dict(vmem_limit=48 << 20, target_d=1024, target_s=2048,
                   target_q=2048, multi_core=True)
    elif "v6" in kind:     # v6e: 128 MiB VMEM, ~1.4 TB/s HBM
        cfg = dict(vmem_limit=96 << 20, target_d=1024, target_s=2048,
                   target_q=4096, multi_core=False)
    elif "v5" in kind:     # v5e: 128 MiB VMEM, ~0.82 TB/s HBM
        cfg = dict(vmem_limit=64 << 20, target_d=512, target_s=1024,
                   target_q=2048, multi_core=False)
    else:                  # unknown / older generation: stay conservative
        cfg = dict(vmem_limit=32 << 20, target_d=512, target_s=1024,
                   target_q=2048, multi_core=False)
    try:   # refine against physical VMEM when the query is available
        cap = getattr(pltpu.get_tpu_info(), "vmem_capacity_bytes", None)
        if cap:
            cfg["vmem_limit"] = min(cfg["vmem_limit"], int(cap) * 3 // 4)
    except Exception:
        pass
    return cfg


def _fit(x, rows, cols, dtype):
    """Zero-pad to (rows, cols) and cast; pass through if already exact."""
    if x.shape == (rows, cols) and x.dtype == dtype:
        return x
    return jnp.zeros((rows, cols), dtype).at[:x.shape[0], :x.shape[1]].set(
        x.astype(dtype))


# ---------------------------------------------------------------------------
# Kernel 1: n_src_aug = relu(h_src @ Qw_pad + Qb_pad)
# Qb_pad carries an extra column with bias 1 (and a zero weight column), so
# column `hidden` of the result is exactly 1 for every src row; this lets the
# aggregation matmul also produce the edge-weight row-sum `ws`.
# ---------------------------------------------------------------------------
def _q_proj_kernel(hsrc_ref, qw_ref, qb_ref, nsrc_ref):
    acc = jnp.dot(hsrc_ref[...], qw_ref[...], preferred_element_type=jnp.float32)
    acc = jnp.maximum(acc + qb_ref[...], 0.0)
    nsrc_ref[...] = acc.astype(nsrc_ref.dtype)


# ---------------------------------------------------------------------------
# Kernel 2: tiled weighted aggregation + output projection + L2 normalization.
# grid = (dst tiles [parallel], src tiles [arbitrary reduction]).
# ---------------------------------------------------------------------------
def _agg_kernel(adj_ref, hdst_ref, nsrc_ref, w1_ref, w2_ref, wb_ref,
                out_ref, acc_ref, *, hidden, tile_s, nsrc_resident):
    k = pl.program_id(1)

    @pl.when(k == 0)
    def _():
        acc_ref[...] = jnp.zeros_like(acc_ref)

    if nsrc_resident:
        # Full projected-src table is VMEM-resident; slice the current src tile.
        start = pl.multiple_of(k * tile_s, tile_s)
        nsrc = nsrc_ref[pl.ds(start, tile_s), :]
    else:
        nsrc = nsrc_ref[...]

    adj = adj_ref[...]
    if adj.dtype != nsrc.dtype:
        adj = adj.astype(nsrc.dtype)   # per-tile cast of pass-through f32 adj

    # Weighted neighbor aggregation on the MXU (f32 accumulation).
    acc_ref[...] += jnp.dot(adj, nsrc, preferred_element_type=jnp.float32)

    @pl.when(k == pl.num_programs(1) - 1)
    def _():
        acc = acc_ref[...]
        # Column `hidden` holds sum_s adj[d, s] == ws (padded adj cols are 0).
        ws = jnp.maximum(acc[:, hidden:hidden + 1], 1.0)    # clamp(min=1)
        n = acc * pl.reciprocal(ws, approx=True)            # EUP divide

        # z = relu(cat([n, h_dst]) @ W^T + b) as a split matmul.
        z = (jnp.dot(n.astype(w1_ref.dtype), w1_ref[...],
                     preferred_element_type=jnp.float32)
             + jnp.dot(hdst_ref[...], w2_ref[...],
                       preferred_element_type=jnp.float32)
             + wb_ref[...])
        z = jnp.maximum(z, 0.0)

        # Row-wise L2 normalization with zero-norm guard (rsqrt -> EUP slot).
        norm_sq = jnp.sum(z * z, axis=1, keepdims=True)
        inv_norm = jnp.where(norm_sq == 0.0, 1.0, jax.lax.rsqrt(norm_sq))
        out_ref[...] = (z * inv_norm).astype(out_ref.dtype)


def weighted_sage_conv(h_src, h_dst, adj, q_w, q_b, w_w, w_b,
                       *, matmul_dtype=jnp.bfloat16,
                       tile_d=None, tile_s=None, tile_q=None,
                       vmem_limit_bytes=None):
    """h_src: [Ns, Din], h_dst: [Nd, Din], adj: [Nd, Ns] dense edge weights.
    q_w: [H, Din], q_b: [H], w_w: [Dout, H+Din], w_b: [Dout] (PyTorch layout)."""
    ns, d_in = h_src.shape
    nd = h_dst.shape[0]
    hidden = q_w.shape[0]
    d_out = w_w.shape[0]
    f32 = jnp.float32
    mm_bytes = jnp.dtype(matmul_dtype).itemsize

    cfg = _tpu_defaults()
    target_d = int(tile_d) if tile_d else cfg["target_d"]
    target_s = int(tile_s) if tile_s else cfg["target_s"]
    target_q = int(tile_q) if tile_q else cfg["target_q"]
    vmem_limit = int(vmem_limit_bytes) if vmem_limit_bytes else cfg["vmem_limit"]
    budget = int(vmem_limit * 0.85)

    # Lane-aligned feature dims; +1 hidden column fuses ws into the matmul.
    d_in_p = _round_up(d_in, 128)
    h_p = _round_up(hidden + 1, 128)
    d_out_p = _round_up(d_out, 128)

    nd_p128 = _round_up(nd, 128)
    ns_p128 = _round_up(ns, 128)

    # v7x: keep >= 2 dst tiles so the "parallel" axis feeds both TensorCores.
    if cfg["multi_core"] and nd_p128 >= 256:
        target_d = min(target_d, max(128, (nd_p128 // 2) // 128 * 128))

    tile_d_, nd_p = _pick_tile(nd_p128, target_d)
    tile_s_, ns_p = _pick_tile(ns_p128, target_s)

    # adj pass-through (no wrapper pad/cast pass) when already tile-aligned.
    passthrough_ok = (nd % 128 == 0 and ns % 128 == 0
                      and jnp.issubdtype(adj.dtype, jnp.floating))
    adj_itemsize = (jnp.dtype(adj.dtype).itemsize if passthrough_ok
                    else mm_bytes)

    # Keep the projected src table VMEM-resident when it fits comfortably so it
    # is DMA'd once instead of once per dst tile.
    nsrc_resident = (2 * ns_p * h_p * mm_bytes) <= budget // 4

    def _agg_vmem(td, ts, resident):
        b = 2 * td * ts * adj_itemsize                             # adj stream
        b += 2 * td * d_in_p * mm_bytes                            # h_dst tile
        b += (2 * ns_p if resident else 2 * ts) * h_p * mm_bytes   # n_src_aug
        b += 2 * (h_p + d_in_p) * d_out_p * mm_bytes               # W1 | W2
        b += 2 * d_out_p * 4                                       # W bias
        b += 2 * td * d_out_p * 4                                  # output tile
        b += td * h_p * 4                                          # f32 accum
        return b

    # Shrink tile_s first (per v7x guidance), then tile_d, then residency.
    for _ in range(32):
        if _agg_vmem(tile_d_, tile_s_, nsrc_resident) <= budget:
            break
        if tile_s_ > 128:
            tile_s_ = _pick_divisor_tile(ns_p, tile_s_ // 2)
        elif tile_d_ > 128:
            tile_d_ = _pick_divisor_tile(nd_p, tile_d_ // 2)
        elif nsrc_resident:
            nsrc_resident = False
        else:
            break
    # Note: at production dims (>=512) on v7x, hoisting h_dst @ W2 + b into its
    # own pass would further slim kernel-2's working set; not needed here.

    # Kernel-1 row tile: independent of (and typically larger than) tile_s.
    tile_q_ = _pick_divisor_tile(ns_p, target_q)
    while tile_q_ > 128 and (2 * tile_q_ * (d_in_p + h_p) * mm_bytes
                             + 2 * d_in_p * h_p * mm_bytes
                             + 2 * h_p * 4) > budget:
        tile_q_ = _pick_divisor_tile(ns_p, tile_q_ // 2)

    # ---- prepare operands (zero padding preserves semantics) ----
    h_src_p = _fit(h_src, ns_p, d_in_p, matmul_dtype)
    h_dst_p = _fit(h_dst, nd_p, d_in_p, matmul_dtype)

    if passthrough_ok and adj.shape == (nd_p, ns_p):
        adj_in = adj                      # read straight from HBM; cast per-tile
    else:
        adj_in = _fit(adj, nd_p, ns_p, matmul_dtype)

    qw_p = jnp.zeros((d_in_p, h_p), matmul_dtype).at[:d_in, :hidden].set(
        q_w.T.astype(matmul_dtype))
    qb_p = jnp.zeros((1, h_p), f32).at[0, :hidden].set(q_b.astype(f32))
    qb_p = qb_p.at[0, hidden].set(1.0)    # relu(0*x + 1) == 1 -> ws column

    w1_p = jnp.zeros((h_p, d_out_p), matmul_dtype).at[:hidden, :d_out].set(
        w_w[:, :hidden].T.astype(matmul_dtype))
    w2_p = jnp.zeros((d_in_p, d_out_p), matmul_dtype).at[:d_in, :d_out].set(
        w_w[:, hidden:].T.astype(matmul_dtype))
    wb_p = jnp.zeros((1, d_out_p), f32).at[0, :d_out].set(w_b.astype(f32))

    # ---- Kernel 1: Q projection over src rows (runs once, large row tiles) ----
    n_src_aug = pl.pallas_call(
        _q_proj_kernel,
        out_shape=jax.ShapeDtypeStruct((ns_p, h_p), matmul_dtype),
        grid=(ns_p // tile_q_,),
        in_specs=[
            pl.BlockSpec((tile_q_, d_in_p), lambda i: (i, 0)),
            pl.BlockSpec((d_in_p, h_p), lambda i: (0, 0)),
            pl.BlockSpec((1, h_p), lambda i: (0, 0)),
        ],
        out_specs=pl.BlockSpec((tile_q_, h_p), lambda i: (i, 0)),
        compiler_params=pltpu.CompilerParams(
            dimension_semantics=("parallel",),
            vmem_limit_bytes=vmem_limit),
        cost_estimate=pl.CostEstimate(
            flops=int(2 * ns_p * d_in_p * h_p),
            transcendentals=0,
            bytes_accessed=int((ns_p * d_in_p + d_in_p * h_p + ns_p * h_p)
                               * mm_bytes)),
    )(h_src_p, qw_p, qb_p)

    # ---- Kernel 2: (dst tiles x src tiles) aggregation + finalize ----
    if nsrc_resident:
        nsrc_spec = pl.BlockSpec((ns_p, h_p), lambda i, k: (0, 0))
        nsrc_reads = 1
    else:
        nsrc_spec = pl.BlockSpec((tile_s_, h_p), lambda i, k: (k, 0))
        nsrc_reads = nd_p // tile_d_

    adj_read_bytes = nd_p * ns_p * jnp.dtype(adj_in.dtype).itemsize

    out_p = pl.pallas_call(
        functools.partial(_agg_kernel, hidden=hidden, tile_s=tile_s_,
                          nsrc_resident=nsrc_resident),
        out_shape=jax.ShapeDtypeStruct((nd_p, d_out_p), f32),
        grid=(nd_p // tile_d_, ns_p // tile_s_),
        in_specs=[
            pl.BlockSpec((tile_d_, tile_s_), lambda i, k: (i, k)),   # adj tile
            pl.BlockSpec((tile_d_, d_in_p), lambda i, k: (i, 0)),    # h_dst tile
            nsrc_spec,                                               # n_src | 1
            pl.BlockSpec((h_p, d_out_p), lambda i, k: (0, 0)),       # W[:, :H]^T
            pl.BlockSpec((d_in_p, d_out_p), lambda i, k: (0, 0)),    # W[:, H:]^T
            pl.BlockSpec((1, d_out_p), lambda i, k: (0, 0)),         # W bias
        ],
        out_specs=pl.BlockSpec((tile_d_, d_out_p), lambda i, k: (i, 0)),
        scratch_shapes=[pltpu.VMEM((tile_d_, h_p), f32)],            # n_agg|ws
        compiler_params=pltpu.CompilerParams(
            dimension_semantics=("parallel", "arbitrary"),
            vmem_limit_bytes=vmem_limit),
        cost_estimate=pl.CostEstimate(
            flops=int(2 * nd_p * ns_p * h_p
                      + 2 * nd_p * (h_p + d_in_p) * d_out_p),
            transcendentals=int(2 * nd_p),
            bytes_accessed=int(adj_read_bytes
                               + nsrc_reads * ns_p * h_p * mm_bytes
                               + nd_p * d_in_p * mm_bytes
                               + (h_p + d_in_p) * d_out_p * mm_bytes
                               + d_out_p * 4
                               + nd_p * d_out_p * 4)),
    )(adj_in, h_dst_p, n_src_aug, w1_p, w2_p, wb_p)

    # Slice off row/column padding.
    return out_p[:nd, :d_out]


def _xavier_uniform(key, shape, gain):
    fan_out, fan_in = shape
    bound = gain * math.sqrt(6.0 / (fan_in + fan_out))
    return jax.random.uniform(key, shape, jnp.float32, -bound, bound)


def _reference(h_src, h_dst, adj, q_w, q_b, w_w, w_b):
    n_src = jax.nn.relu(h_src @ q_w.T + q_b)
    n_agg = adj @ n_src
    ws = jnp.maximum(adj.sum(axis=1, keepdims=True), 1.0)
    z = jax.nn.relu(jnp.concatenate([n_agg / ws, h_dst], axis=1) @ w_w.T + w_b)
    z_norm = jnp.linalg.norm(z, axis=1, keepdims=True)
    z_norm = jnp.where(z_norm == 0.0, 1.0, z_norm)
    return z / z_norm


def _make_case(key, num_src, num_dst, input_dims, hidden_dims, output_dims):
    k_hs, k_hd, k_adj, k_qw, k_ww = jax.random.split(key, 5)
    h_src = jax.random.normal(k_hs, (num_src, input_dims), jnp.float32)
    h_dst = jax.random.normal(k_hd, (num_dst, input_dims), jnp.float32)
    # Dense weighted adjacency: random nonnegative weights, ~50% sparsity.
    raw = jax.random.uniform(k_adj, (num_dst, num_src), jnp.float32)
    adj = jnp.where(raw > 0.5, raw, 0.0)
    # Parameter init mirrors reset_parameters(): xavier_uniform(relu gain), 0 bias.
    gain = math.sqrt(2.0)  # nn.init.calculate_gain('relu')
    q_w = _xavier_uniform(k_qw, (hidden_dims, input_dims), gain)
    q_b = jnp.zeros((hidden_dims,), jnp.float32)
    w_w = _xavier_uniform(k_ww, (output_dims, input_dims + hidden_dims), gain)
    w_b = jnp.zeros((output_dims,), jnp.float32)
    return h_src, h_dst, adj, q_w, q_b, w_w, w_b


if __name__ == "__main__":
    # TODO(synk): nn.Dropout(0.5) is identity in eval mode; training-mode dropout omitted.
    key = jax.random.PRNGKey(0)
    k1, k2 = jax.random.split(key)

    # Case 1: small, unaligned shapes (exercises the pad + cast path).
    args1 = _make_case(k1, num_src=16, num_dst=8,
                       input_dims=32, hidden_dims=32, output_dims=32)
    z1 = jax.block_until_ready(weighted_sage_conv(*args1))
    z1_ref = _reference(*args1)
    assert z1.shape == z1_ref.shape
    # bf16 matmul inputs (f32 accumulation) => tolerance loosened vs f32 reference.
    assert jnp.allclose(z1, z1_ref, atol=2e-2, rtol=2e-2), (
        float(jnp.max(jnp.abs(z1 - z1_ref))))

    # Case 2: 128-aligned shapes (exercises the f32-adj pass-through, the
    # VMEM-resident n_src table and a multi-tile (dst x src) grid).
    args2 = _make_case(k2, num_src=384, num_dst=256,
                       input_dims=64, hidden_dims=48, output_dims=40)
    z2 = jax.block_until_ready(weighted_sage_conv(*args2, tile_d=128, tile_s=128))
    z2_ref = _reference(*args2)
    assert z2.shape == z2_ref.shape
    assert jnp.allclose(z2, z2_ref, atol=3e-2, rtol=3e-2), (
        float(jnp.max(jnp.abs(z2 - z2_ref))))

    print("KERNEL_OK")
</pallas_src>

<mosaic_0001>
module attributes {stable_mosaic.version = 11 : i64} {
  func.func @_q_proj_kernel(%arg0: i32, %arg1: memref<128x128xbf16, #tpu.memory_space<vmem>>, %arg2: memref<128x128xbf16, #tpu.memory_space<vmem>>, %arg3: memref<1x128xf32, #tpu.memory_space<vmem>>, %arg4: memref<128x128xbf16, #tpu.memory_space<vmem>>) attributes {dimension_semantics = [#tpu.dimension_semantics<parallel>], iteration_bounds = array<i64: 1>, scalar_prefetch = 0 : i64, scratch_operands = 0 : i64, tpu.core_type = #tpu.core_type<tc>, window_params = [{transform_indices = @transform_0, window_bounds = array<i64: 128, 128>}, {pipeline_mode = #tpu.pipeline_mode<synchronous>, transform_indices = @transform_1, window_bounds = array<i64: 128, 128>}, {pipeline_mode = #tpu.pipeline_mode<synchronous>, transform_indices = @transform_2, window_bounds = array<i64: 1, 128>}, {transform_indices = @transform_3, window_bounds = array<i64: 128, 128>}]} {
    %c0 = arith.constant 0 : index
    %c0_0 = arith.constant 0 : index
    %0 = vector.load %arg1[%c0, %c0_0] : memref<128x128xbf16, #tpu.memory_space<vmem>>, vector<128x128xbf16>
    %c0_1 = arith.constant 0 : index
    %c0_2 = arith.constant 0 : index
    %1 = vector.load %arg2[%c0_1, %c0_2] : memref<128x128xbf16, #tpu.memory_space<vmem>>, vector<128x128xbf16>
    %cst = arith.constant dense<0.000000e+00> : vector<128x128xf32>
    %2 = tpu.matmul %0, %1, %cst {dimension_numbers = #tpu.dot_dimension_numbers<[1], [0], [0], [1], [0, 0, 1, 1], [], []>} : vector<128x128xbf16>, vector<128x128xbf16>, vector<128x128xf32> -> vector<128x128xf32>
    %c0_3 = arith.constant 0 : index
    %c0_4 = arith.constant 0 : index
    %3 = vector.load %arg3[%c0_3, %c0_4] : memref<1x128xf32, #tpu.memory_space<vmem>>, vector<1x128xf32>
    %4 = vector.broadcast %3 : vector<1x128xf32> to vector<128x128xf32>
    %5 = arith.addf %2, %4 : vector<128x128xf32>
    %cst_5 = arith.constant 0.000000e+00 : f32
    %6 = vector.broadcast %cst_5 : f32 to vector<128x128xf32>
    %7 = arith.maximumf %5, %6 : vector<128x128xf32>
    %8 = arith.truncf %7 : vector<128x128xf32> to vector<128x128xbf16>
    %c0_6 = arith.constant 0 : index
    %c0_7 = arith.constant 0 : index
    %9 = vector.load %arg4[%c0_6, %c0_7] : memref<128x128xbf16, #tpu.memory_space<vmem>>, vector<128x128xbf16>
    tpu.vector_store %arg4[%c0_6, %c0_7], %8 {strides = array<i32>} : memref<128x128xbf16, #tpu.memory_space<vmem>>, vector<128x128xbf16>,
    return
  }
  func.func @transform_0(%arg0: i32) -> (i32, i32) {
    %c0_i32 = arith.constant 0 : i32
    %c0_i32_0 = arith.constant 0 : i32
    return %arg0, %c0_i32 : i32, i32
  }
  func.func @transform_1(%arg0: i32) -> (i32, i32) {
    %c0_i32 = arith.constant 0 : i32
    %c0_i32_0 = arith.constant 0 : i32
    %c0_i32_1 = arith.constant 0 : i32
    return %c0_i32, %c0_i32_0 : i32, i32
  }
  func.func @transform_2(%arg0: i32) -> (i32, i32) {
    %c0_i32 = arith.constant 0 : i32
    %c0_i32_0 = arith.constant 0 : i32
    %c0_i32_1 = arith.constant 0 : i32
    return %c0_i32, %c0_i32_0 : i32, i32
  }
  func.func @transform_3(%arg0: i32) -> (i32, i32) {
    %c0_i32 = arith.constant 0 : i32
    %c0_i32_0 = arith.constant 0 : i32
    return %arg0, %c0_i32 : i32, i32
  }
}

</mosaic_0001>

<bundles_post_ra>
// kernel: tpu_custom_call.1
= control target key start
LH: loop header
LB: loop body
LE: loop exit
PB: predicated region body
PF: predicated region fallthrough
CT: control target
= control target key end

     0   :  { %8 = vsyncpa [#allocation3], 0  ;;  %s577_s0 = inlined_call_operand.hbm [shape: bf16[128,128], index: 0, kind: input, shape index: {}]   ;;  %s578_s1 = inlined_call_operand.hbm [shape: bf16[128,128], index: 1, kind: input, shape index: {}]   ;;  %s579_s2 = inlined_call_operand.vmem [shape: f32[1,128], index: 2, kind: input, shape index: {}]   ;;  %s580_s3 = inlined_call_operand.hbm [shape: bf16[128,128], index: 3, kind: output, shape index: {}]  }
   0x1   :  { %9 = vsyncpa [#allocation6], 0 }
   0x2   :  { %10 = vsyncpa [#allocation4], 0  ;;  %s15_s14 = sshll.u32 %s577_s0, 4  ;;  %s531_s15 = smov [#allocation2]   ;;  %s16_s14 = int_to_ptr.hbm [resolvable:$true] %s15_s14 }
   0x3   :  { %s17_s16 = sshll.u32 %s531_s15, 4  ;;  %s28_s19 = sshll.u32 %s578_s1, 4  ;;  %s18_s16 = int_to_ptr.vmem [resolvable:$true] %s17_s16  ;;  %s29_s19 = int_to_ptr.hbm [resolvable:$true] %s28_s19 }
   0x4   :  { %s532_s20 = smov 64   ;;  %s533_s21 = smov 4  }
   0x5   :  { %23 = dma.hbm_to_vmem [thread:$0]  %s16_s14, 1024, %s18_s16, [#allocation3], %s532_s20, %s532_s20, %s533_s21  }
   0x6   :  { %s534_s22 = smov [#allocation5]  }
   0x7   :  { %s30_s23 = sshll.u32 %s534_s22, 4  ;;  %s31_s23 = int_to_ptr.vmem [resolvable:$true] %s30_s23 }
   0x8   :  { %36 = dma.hbm_to_vmem [thread:$0]  %s29_s19, 1024, %s31_s23, [#allocation6], %s532_s20, %s532_s20, %s533_s21  }
   0x9   :  { %525 = dma.done.wait [#allocation3], 1024  }
   0xa   :  { %526 = vsyncadd [#allocation3], 4294966272 }
   0xb   :  { %527 = dma.done.wait [#allocation6], 1024  }
   0xc   :  { %528 = vsyncadd [#allocation6], 4294966272  ;;  %v375_v0 = vld [vmem:[#allocation5 + $0x38] sm:$0xff]  ;;  %v374_v1 = vld [vmem:[#allocation5 + $0x30] sm:$0xff]  ;;  %s282_s27 = sshll.u32 %s580_s3, 4  ;;  %s283_s27 = int_to_ptr.hbm [resolvable:$true] %s282_s27 }
   0xd   :  { %179 = vmatpush.bf16.msra.mxu0 %v375_v0  ;;  %423 = vmatpush.bf16.msra.mxu1 %v375_v0  ;;  %v373_v2 = vld [vmem:[#allocation5 + $0x28] sm:$0xff]  ;;  %v372_v3 = vld [vmem:[#allocation5 + $0x20] sm:$0xff]  ;;  %v371_v4 = vld [vmem:[#allocation5 + $0x18] sm:$0xff] }
   0xe   :  { %424 = vmatpush.bf16.msra.mxu2 %v375_v0  ;;  %425 = vmatpush.bf16.msra.mxu3 %v375_v0  ;;  %v370_v5 = vld [vmem:[#allocation5 + $0x10] sm:$0xff]  ;;  %v369_v6 = vld [vmem:[#allocation5 + $0x8] sm:$0xff]  ;;  %v368_v7 = vld [vmem:[#allocation5] sm:$0xff] }
   0xf   :  { %v360_v8 = vld [vmem:[#allocation2] sm:$0xff]  ;;  %v362_v9 = vld [vmem:[#allocation2 + $0x10] sm:$0xff]  ;;  %v361_v12 = vld [vmem:[#allocation2 + $0x8] sm:$0xff] }
  0x10   :  { %v364_v10 = vld [vmem:[#allocation2 + $0x20] sm:$0xff]  ;;  %v366_v11 = vld [vmem:[#allocation2 + $0x30] sm:$0xff]  ;;  %v363_v13 = vld [vmem:[#allocation2 + $0x18] sm:$0xff] }
  0x11   :  { %180 = vmatpush.bf16.msra.mxu0 %v374_v1  ;;  %426 = vmatpush.bf16.msra.mxu1 %v374_v1  ;;  %v365_v14 = vld [vmem:[#allocation2 + $0x28] sm:$0xff]  ;;  %v367_v15 = vld [vmem:[#allocation2 + $0x38] sm:$0xff]  ;;  %v452_v18 = vld [vmem:[%s579_s2] ss:$0 sm:$0xff]  ;;  %s535_s2 = smov [#allocation7]  }
  0x12   :  { %427 = vmatpush.bf16.msra.mxu2 %v374_v1  ;;  %428 = vmatpush.bf16.msra.mxu3 %v374_v1  ;;  %s280_s24 = sshll.u32 %s535_s2, 4  ;;  %s281_s24 = int_to_ptr.vmem [resolvable:$true] %s280_s24 }
  0x15   :  { %181 = vmatpush.bf16.msra.mxu0 %v373_v2  ;;  %429 = vmatpush.bf16.msra.mxu1 %v373_v2 }
  0x16   :  { %430 = vmatpush.bf16.msra.mxu2 %v373_v2  ;;  %431 = vmatpush.bf16.msra.mxu3 %v373_v2 }
  0x19   :  { %182 = vmatpush.bf16.msra.mxu0 %v372_v3  ;;  %432 = vmatpush.bf16.msra.mxu1 %v372_v3 }
  0x1a   :  { %433 = vmatpush.bf16.msra.mxu2 %v372_v3  ;;  %434 = vmatpush.bf16.msra.mxu3 %v372_v3 }
  0x1d   :  { %183 = vmatpush.bf16.msra.mxu0 %v371_v4  ;;  %435 = vmatpush.bf16.msra.mxu1 %v371_v4 }
  0x1e   :  { %436 = vmatpush.bf16.msra.mxu2 %v371_v4  ;;  %437 = vmatpush.bf16.msra.mxu3 %v371_v4 }
  0x21   :  { %184 = vmatpush.bf16.msra.mxu0 %v370_v5  ;;  %438 = vmatpush.bf16.msra.mxu1 %v370_v5 }
  0x22   :  { %439 = vmatpush.bf16.msra.mxu2 %v370_v5  ;;  %440 = vmatpush.bf16.msra.mxu3 %v370_v5 }
  0x25   :  { %185 = vmatpush.bf16.msra.mxu0 %v369_v6  ;;  %441 = vmatpush.bf16.msra.mxu1 %v369_v6 }
  0x26   :  { %442 = vmatpush.bf16.msra.mxu2 %v369_v6  ;;  %443 = vmatpush.bf16.msra.mxu3 %v369_v6 }
  0x29   :  { %186 = vmatpush.bf16.msra.mxu0 %v368_v7  ;;  %444 = vmatpush.bf16.msra.mxu1 %v368_v7 }
  0x2a   :  { %445 = vmatpush.bf16.msra.mxu2 %v368_v7  ;;  %446 = vmatpush.bf16.msra.mxu3 %v368_v7 }
  0x2c   :  { %187 = vmatmul.bf16.vlgmr.msra.gmra.mxu0 %v360_v8  ;;  %197 = vmatmul.bf16.vlgmr.msra.gmra.mxu1 %v362_v9 }
  0x2d   :  { %207 = vmatmul.bf16.vlgmr.msra.gmra.mxu2 %v364_v10  ;;  %217 = vmatmul.bf16.vlgmr.msra.gmra.mxu3 %v366_v11 }
  0x3c   :  { %192 = vmatmul.bf16.gmra.mxu0 %v361_v12  ;;  %202 = vmatmul.bf16.gmra.mxu1 %v363_v13 }
  0x3d   :  { %212 = vmatmul.bf16.gmra.mxu2 %v365_v14  ;;  %222 = vmatmul.bf16.gmra.mxu3 %v367_v15 }
  0xa9   :  { %v188_v16 = vpop.f32.mrf.mxu0  ;;  %v198_v17 = vpop.f32.mrf.mxu1 }
  0xaa   :  { %v189_v19 = vadd.f32 %v452_v18, %v188_v16  ;;  %v199_v20 = vadd.f32 %v452_v18, %v198_v17 }
  0xac   :  { %v228_v27 = vmax.f32 %v189_v19, 0.0  ;;  %v232_v28 = vmax.f32 %v199_v20, 0.0 }
  0xb0   :  { %v208_v21 = vpop.f32.mrf.mxu2  ;;  %v218_v22 = vpop.f32.mrf.mxu3 }
  0xb1   :  { %v190_v23 = vpop.f32.mrf.mxu0  ;;  %v200_v24 = vpop.f32.mrf.mxu1  ;;  %v209_v33 = vadd.f32 %v452_v18, %v208_v21  ;;  %v219_v34 = vadd.f32 %v452_v18, %v218_v22 }
  0xb2   :  { %v191_v25 = vadd.f32 %v452_v18, %v190_v23  ;;  %v201_v26 = vadd.f32 %v452_v18, %v200_v24 }
  0xb3   :  { %v236_v41 = vmax.f32 %v209_v33, 0.0  ;;  %v240_v42 = vmax.f32 %v219_v34, 0.0 }
  0xb4   :  { %v229_v29 = vmax.f32 %v191_v25, 0.0  ;;  %v233_v30 = vmax.f32 %v201_v26, 0.0 }
  0xb6   :  { %v379_v31 = vpack.c.bf16 %v229_v29, %v228_v27  ;;  %v389_v32 = vpack.c.bf16 %v233_v30, %v232_v28 }
  0xb8   :  { %380 = vst [vmem:[#allocation7] sm:$0xff] %v379_v31   ;;  %v210_v35 = vpop.f32.mrf.mxu2  ;;  %v220_v36 = vpop.f32.mrf.mxu3 }
  0xb9   :  { %417 = vst [vmem:[#allocation7 + $0x10] sm:$0xff] %v389_v32   ;;  %v211_v37 = vadd.f32 %v452_v18, %v210_v35  ;;  %v221_v38 = vadd.f32 %v452_v18, %v220_v36  ;;  %v193_v39 = vpop.f32.mrf.mxu0  ;;  %v203_v40 = vpop.f32.mrf.mxu1 }
  0xba   :  { %v194_v47 = vadd.f32 %v452_v18, %v193_v39  ;;  %v204_v48 = vadd.f32 %v452_v18, %v203_v40 }
  0xbb   :  { %v237_v43 = vmax.f32 %v211_v37, 0.0  ;;  %v241_v44 = vmax.f32 %v221_v38, 0.0 }
  0xbc   :  { %v230_v55 = vmax.f32 %v194_v47, 0.0  ;;  %v234_v56 = vmax.f32 %v204_v48, 0.0 }
  0xbd   :  { %v399_v45 = vpack.c.bf16 %v237_v43, %v236_v41  ;;  %v409_v46 = vpack.c.bf16 %v241_v44, %v240_v42 }
  0xbf   :  { %419 = vst [vmem:[#allocation7 + $0x20] sm:$0xff] %v399_v45  }
  0xc0   :  { %421 = vst [vmem:[#allocation7 + $0x30] sm:$0xff] %v409_v46   ;;  %v213_v49 = vpop.f32.mrf.mxu2  ;;  %v223_v50 = vpop.f32.mrf.mxu3 }
  0xc1   :  { %v195_v51 = vpop.f32.mrf.mxu0  ;;  %v205_v52 = vpop.f32.mrf.mxu1  ;;  %v214_v61 = vadd.f32 %v452_v18, %v213_v49  ;;  %v224_v62 = vadd.f32 %v452_v18, %v223_v50 }
  0xc2   :  { %v196_v53 = vadd.f32 %v452_v18, %v195_v51  ;;  %v206_v54 = vadd.f32 %v452_v18, %v205_v52 }
  0xc3   :  { %v238_v3 = vmax.f32 %v214_v61, 0.0  ;;  %v242_v4 = vmax.f32 %v224_v62, 0.0 }
  0xc4   :  { %v231_v57 = vmax.f32 %v196_v53, 0.0  ;;  %v235_v58 = vmax.f32 %v206_v54, 0.0 }
  0xc6   :  { %v384_v59 = vpack.c.bf16 %v231_v57, %v230_v55  ;;  %v394_v60 = vpack.c.bf16 %v235_v58, %v234_v56 }
  0xc8   :  { %416 = vst [vmem:[#allocation7 + $0x8] sm:$0xff] %v384_v59   ;;  %v215_v63 = vpop.f32.mrf.mxu2  ;;  %v225_v0 = vpop.f32.mrf.mxu3 }
  0xc9   :  { %418 = vst [vmem:[#allocation7 + $0x18] sm:$0xff] %v394_v60   ;;  %v216_v1 = vadd.f32 %v452_v18, %v215_v63  ;;  %v226_v2 = vadd.f32 %v452_v18, %v225_v0 }
  0xcb   :  { %v239_v5 = vmax.f32 %v216_v1, 0.0  ;;  %v243_v6 = vmax.f32 %v226_v2, 0.0 }
  0xcd   :  { %v404_v7 = vpack.c.bf16 %v239_v5, %v238_v3  ;;  %v414_v8 = vpack.c.bf16 %v243_v6, %v242_v4 }
  0xcf   :  { %420 = vst [vmem:[#allocation7 + $0x28] sm:$0xff] %v404_v7  }
  0xd0   :  { %422 = vst [vmem:[#allocation7 + $0x38] sm:$0xff] %v414_v8  }
  0xd1   :  { %288 = dma.vmem_to_hbm [thread:$0]  %s281_s24, 1024, %s283_s27, [#allocation4], %s532_s20, %s532_s20, %s533_s21  }
  0xd2   :  { %529 = dma.done.wait [#allocation4], 1024  }
  0xd3   :  { %530 = vsyncadd [#allocation4], 4294966272 }
  0xd4   :  { %293 = vsyncpa [#allocation3], 1 }
  0xd5   :  { %294 = vsyncpa [#allocation6], 1 }
  0xd6   :  { %295 = vsyncpa [#allocation4], 1 }

</bundles_post_ra>
